<compile_context>
chip_gen: v5e
topology: v5e:2x2
jax: 0.10.0
libtpu: 0.0.40
codegen_flags: <defaults>
</compile_context>

<pallas_src>
import jax
import jax.numpy as jnp
from jax.experimental import pallas as pl
from jax.experimental.pallas import tpu as pltpu


def _round_up(x, m):
    return (x + m - 1) // m * m


def _choose_tm(n_rows, per_row_bytes, sublane, *, max_tm=8192, min_tm=512,
               vmem_budget=12 << 20):
    """Largest row tile that (a) fits the double-buffered VMEM budget,
    (b) keeps >= 4 grid steps on large N (so v7x's 2 TCs each get >= 2 steps),
    (c) is a sublane multiple (partial last block is handled by Pallas)."""
    tm = max(sublane, vmem_budget // max(per_row_bytes, 1))
    tm = min(tm, max_tm)
    if n_rows >= 4 * min_tm:
        tm = min(tm, pl.cdiv(n_rows, 4))
    tm = min(tm, n_rows)
    tm = max(tm, 1)
    return _round_up(tm, sublane)


# ----------------------------- kernels --------------------------------------


def _folded_kernel(x_ref, w_ref, o_ref):
    # act=False: y = x @ (W2 @ W1).T (possibly lane-packed / block-diagonal W).
    o_ref[...] = jnp.dot(
        x_ref[...], w_ref[...], preferred_element_type=jnp.float32
    ).astype(o_ref.dtype)


def _act_kernel(x_ref, w1t_ref, w2t_ref, o_ref):
    # act=True: two MXU passes fused, swish on the f32 accumulator (EUP).
    h = jnp.dot(x_ref[...], w1t_ref[...], preferred_element_type=jnp.float32)
    h = h * jax.nn.sigmoid(h)
    y = jnp.dot(
        h.astype(w2t_ref.dtype), w2t_ref[...], preferred_element_type=jnp.float32
    )
    y = y * jax.nn.sigmoid(y)
    o_ref[...] = y.astype(o_ref.dtype)


# ----------------------------- wrapper ---------------------------------------


def two_linear(x, w1, w2, *, act: bool = False, tm: int | None = None,
               pack: int | None = None, out_dtype=None):
    """Fused TwoLinear forward.

    x:  [N, in_channels]                (f32 or bf16 — dtype is respected)
    w1: [middle_channels, in_channels]  (PyTorch F.linear weight layout)
    w2: [out_channels, middle_channels]
    """
    n, cin = x.shape
    cmid, cin_w = w1.shape
    cout, cmid_w = w2.shape
    assert cin == cin_w and cmid == cmid_w

    dtype = x.dtype
    out_dtype = dtype if out_dtype is None else out_dtype
    itemsize = jnp.dtype(dtype).itemsize
    out_itemsize = jnp.dtype(out_dtype).itemsize
    sublane = max(8, 32 // itemsize)  # 8 for f32, 16 for bf16

    cparams = pltpu.CompilerParams(dimension_semantics=("parallel",))

    if not act:
        # ---- folded path: y = x @ (W2 @ W1).T ------------------------------
        # Fold once in f32 (avoid double rounding), cast once to the compute
        # dtype.  The fold is a one-off [Cout,Cmid]x[Cmid,Cin] matmul outside
        # the kernel.
        wc = jnp.matmul(w2.astype(jnp.float32), w1.astype(jnp.float32),
                        precision=jax.lax.Precision.HIGHEST)   # [Cout, Cin]
        wct = wc.T                                             # [Cin, Cout]

        # Lane packing: P rows of x become one packed row; the weight becomes
        # a P-way block diagonal so packed_row @ W_diag = concat of the P row
        # results.  Targets 128 output lanes (unmasked stores).
        if pack is None:
            pack = 1
            if cout < 128:
                p = min(8, max(1, 128 // cout))
                while p > 1 and n % p != 0:
                    p //= 2
                pack = p

        if pack > 1:
            xk = x.reshape(n // pack, pack * cin)  # metadata-only (row-major)
            wk = jnp.kron(jnp.eye(pack, dtype=jnp.float32), wct).astype(dtype)
            n_k, cin_k, cout_k = n // pack, pack * cin, pack * cout
        else:
            xk = x
            wk = wct.astype(dtype)
            n_k, cin_k, cout_k = n, cin, cout

        per_row = 2 * (_round_up(cin_k, 128) * itemsize
                       + _round_up(cout_k, 128) * out_itemsize)
        tm_k = tm if tm is not None else _choose_tm(n_k, per_row, sublane)
        tm_k = max(sublane, _round_up(min(tm_k, _round_up(n_k, sublane)), sublane))

        grid = (pl.cdiv(n_k, tm_k),)
        out = pl.pallas_call(
            _folded_kernel,
            out_shape=jax.ShapeDtypeStruct((n_k, cout_k), out_dtype),
            grid_spec=pltpu.PrefetchScalarGridSpec(
                num_scalar_prefetch=0,
                grid=grid,
                in_specs=[
                    pl.BlockSpec((tm_k, cin_k), lambda i: (i, 0)),
                    pl.BlockSpec((cin_k, cout_k), lambda i: (0, 0)),
                ],
                out_specs=pl.BlockSpec((tm_k, cout_k), lambda i: (i, 0)),
            ),
            compiler_params=cparams,
        )(xk, wk)
        return out.reshape(n, cout) if pack > 1 else out

    # ---- act=True path: two matmuls + swish --------------------------------
    w1t = w1.T.astype(dtype)   # [Cin, Cmid]  (MXU-native K x N layout)
    w2t = w2.T.astype(dtype)   # [Cmid, Cout]

    # Budget includes the lane-padded f32 intermediate h (+ one swish temp).
    per_row = (2 * (_round_up(cin, 128) * itemsize
                    + _round_up(cout, 128) * out_itemsize)
               + 2 * _round_up(cmid, 128) * 4)
    tm_a = tm if tm is not None else _choose_tm(n, per_row, sublane, max_tm=4096)
    tm_a = max(sublane, _round_up(min(tm_a, _round_up(n, sublane)), sublane))

    grid = (pl.cdiv(n, tm_a),)
    out = pl.pallas_call(
        _act_kernel,
        out_shape=jax.ShapeDtypeStruct((n, cout), out_dtype),
        grid_spec=pltpu.PrefetchScalarGridSpec(
            num_scalar_prefetch=0,
            grid=grid,
            in_specs=[
                pl.BlockSpec((tm_a, cin), lambda i: (i, 0)),
                pl.BlockSpec((cin, cmid), lambda i: (0, 0)),   # resident weights
                pl.BlockSpec((cmid, cout), lambda i: (0, 0)),
            ],
            out_specs=pl.BlockSpec((tm_a, cout), lambda i: (i, 0)),
        ),
        compiler_params=cparams,
    )(x, w1t, w2t)
    return out


# ----------------------------- reference / test -------------------------------


def glorot(key, shape):
    # PyG-style glorot: uniform(-a, a), a = sqrt(6 / (fan_in + fan_out))
    fan_out, fan_in = shape
    a = (6.0 / (fan_in + fan_out)) ** 0.5
    return jax.random.uniform(key, shape, jnp.float32, minval=-a, maxval=a)


def two_linear_ref(x, w1, w2, act):
    h = x @ w1.T
    if act:
        h = h * jax.nn.sigmoid(h)
    y = h @ w2.T
    if act:
        y = y * jax.nn.sigmoid(y)
    return y


if __name__ == "__main__":
    # Channel sizes consistent with the module; N chosen small but large
    # enough to exercise the lane-packed path, plus a ragged-N case that
    # exercises the cdiv/partial-block path and the pack fallback.
    CIN, CMID, COUT = 32, 64, 16

    key = jax.random.PRNGKey(0)
    kx, k1, k2 = jax.random.split(key, 3)

    w1 = glorot(k1, (CMID, CIN))   # lin1.weight  [middle, in]
    w2 = glorot(k2, (COUT, CMID))  # lin2.weight  [out, middle]

    x_big = jax.random.normal(kx, (1024, CIN), jnp.float32)
    x_rag = x_big[:100]            # 100 % 8 != 0 -> pack=4, partial last block

    # Default TwoLinear config (bias=False, act=False): folded + lane-packed.
    out = jax.block_until_ready(two_linear(x_big, w1, w2, act=False))
    out_rag = jax.block_until_ready(two_linear(x_rag, w1, w2, act=False))

    # act=True (swish) path: fused two-matmul kernel.
    out_act = jax.block_until_ready(two_linear(x_big, w1, w2, act=True))

    # bf16 activations supplied by the "producer" (no wrapper-side cast of x).
    x_bf16 = x_big.astype(jnp.bfloat16)
    out_bf16 = jax.block_until_ready(two_linear(x_bf16, w1, w2, act=True))

    ref = two_linear_ref(x_big, w1, w2, False)
    ref_rag = two_linear_ref(x_rag, w1, w2, False)
    ref_act = two_linear_ref(x_big, w1, w2, True)

    assert out.shape == (1024, COUT) and out_act.shape == (1024, COUT)
    assert out_rag.shape == (100, COUT)
    assert jnp.allclose(out, ref, atol=1e-4, rtol=1e-4)
    assert jnp.allclose(out_rag, ref_rag, atol=1e-4, rtol=1e-4)
    assert jnp.allclose(out_act, ref_act, atol=1e-4, rtol=1e-4)
    assert out_bf16.dtype == jnp.bfloat16
    assert jnp.allclose(out_bf16.astype(jnp.float32), ref_act, atol=5e-2, rtol=5e-2)

    print("KERNEL_OK")
</pallas_src>

<mosaic_0001>
module attributes {stable_mosaic.version = 11 : i64} {
  func.func @_folded_kernel(%arg0: i32, %arg1: memref<128x256xf32, #tpu.memory_space<vmem>>, %arg2: memref<256x128xf32, #tpu.memory_space<vmem>>, %arg3: memref<128x128xf32, #tpu.memory_space<vmem>>) attributes {dimension_semantics = [#tpu.dimension_semantics<parallel>], iteration_bounds = array<i64: 1>, scalar_prefetch = 0 : i64, scratch_operands = 0 : i64, tpu.core_type = #tpu.core_type<tc>, window_params = [{transform_indices = @transform_0, window_bounds = array<i64: 128, 256>}, {pipeline_mode = #tpu.pipeline_mode<synchronous>, transform_indices = @transform_1, window_bounds = array<i64: 256, 128>}, {transform_indices = @transform_2, window_bounds = array<i64: 128, 128>}]} {
    %c0 = arith.constant 0 : index
    %c0_0 = arith.constant 0 : index
    %0 = vector.load %arg1[%c0, %c0_0] : memref<128x256xf32, #tpu.memory_space<vmem>>, vector<128x256xf32>
    %c0_1 = arith.constant 0 : index
    %c0_2 = arith.constant 0 : index
    %1 = vector.load %arg2[%c0_1, %c0_2] : memref<256x128xf32, #tpu.memory_space<vmem>>, vector<256x128xf32>
    %cst = arith.constant dense<0.000000e+00> : vector<128x128xf32>
    %2 = tpu.matmul %0, %1, %cst {dimension_numbers = #tpu.dot_dimension_numbers<[1], [0], [0], [1], [0, 0, 1, 1], [], []>} : vector<128x256xf32>, vector<256x128xf32>, vector<128x128xf32> -> vector<128x128xf32>
    %c0_3 = arith.constant 0 : index
    %c0_4 = arith.constant 0 : index
    %3 = vector.load %arg3[%c0_3, %c0_4] : memref<128x128xf32, #tpu.memory_space<vmem>>, vector<128x128xf32>
    tpu.vector_store %arg3[%c0_3, %c0_4], %2 {strides = array<i32>} : memref<128x128xf32, #tpu.memory_space<vmem>>, vector<128x128xf32>,
    return
  }
  func.func @transform_0(%arg0: i32) -> (i32, i32) {
    %c0_i32 = arith.constant 0 : i32
    %c0_i32_0 = arith.constant 0 : i32
    return %arg0, %c0_i32 : i32, i32
  }
  func.func @transform_1(%arg0: i32) -> (i32, i32) {
    %c0_i32 = arith.constant 0 : i32
    %c0_i32_0 = arith.constant 0 : i32
    %c0_i32_1 = arith.constant 0 : i32
    return %c0_i32, %c0_i32_0 : i32, i32
  }
  func.func @transform_2(%arg0: i32) -> (i32, i32) {
    %c0_i32 = arith.constant 0 : i32
    %c0_i32_0 = arith.constant 0 : i32
    return %arg0, %c0_i32 : i32, i32
  }
}

</mosaic_0001>

<bundles_post_ra>
// kernel: tpu_custom_call.1
= control target key start
LH: loop header
LB: loop body
LE: loop exit
PB: predicated region body
PF: predicated region fallthrough
CT: control target
= control target key end

     0   :  { %7 = vsyncpa [#allocation3], 0  ;;  %s428_s0 = inlined_call_operand.hbm [shape: f32[128,256], index: 0, kind: input, shape index: {}]   ;;  %s429_s1 = inlined_call_operand.hbm [shape: f32[256,128], index: 1, kind: input, shape index: {}]   ;;  %s430_s2 = inlined_call_operand.hbm [shape: f32[128,128], index: 2, kind: output, shape index: {}]  }
   0x1   :  { %8 = vsyncpa [#allocation6], 0 }
   0x2   :  { %9 = vsyncpa [#allocation4], 0  ;;  %s14_s11 = sshll.u32 %s428_s0, 4  ;;  %s391_s12 = smov [#allocation2]   ;;  %s15_s11 = int_to_ptr.hbm [resolvable:$true] %s14_s11 }
   0x3   :  { %s16_s13 = sshll.u32 %s391_s12, 4  ;;  %s27_s16 = sshll.u32 %s429_s1, 4  ;;  %s17_s13 = int_to_ptr.vmem [resolvable:$true] %s16_s13  ;;  %s28_s16 = int_to_ptr.hbm [resolvable:$true] %s27_s16 }
   0x4   :  { %s392_s17 = smov 256   ;;  %s393_s18 = smov 16  }
   0x5   :  { %22 = dma.hbm_to_vmem [thread:$0]  %s15_s11, 4096, %s17_s13, [#allocation3], %s392_s17, %s392_s17, %s393_s18  }
   0x6   :  { %s394_s19 = smov [#allocation5]   ;;  %s395_s21 = smov 128  }
   0x7   :  { %s29_s20 = sshll.u32 %s394_s19, 4  ;;  %s396_s22 = smov 8   ;;  %s30_s20 = int_to_ptr.vmem [resolvable:$true] %s29_s20 }
   0x8   :  { %35 = dma.hbm_to_vmem [thread:$0]  %s28_s16, 4096, %s30_s20, [#allocation6], %s395_s21, %s395_s21, %s396_s22  }
   0x9   :  { %385 = dma.done.wait [#allocation3], 4096  }
   0xa   :  { %386 = vsyncadd [#allocation3], 4294963200 }
   0xb   :  { %387 = dma.done.wait [#allocation6], 4096  }
   0xc   :  { %388 = vsyncadd [#allocation6], 4294963200  ;;  %v91_v0 = vld [vmem:[#allocation5 + $0x78] sm:$0xff]  ;;  %v90_v2 = vld [vmem:[#allocation5 + $0x70] sm:$0xff]  ;;  %s397_s0 = smov [#allocation7]   ;;  %s260_s25 = sshll.u32 %s430_s2, 4  ;;  %s261_s25 = int_to_ptr.hbm [resolvable:$true] %s260_s25 }
   0xd   :  { %v107_v1 = vld [vmem:[#allocation5 + $0xf8] sm:$0xff]  ;;  %274 = vmatpush.msra.mxu2 %v91_v0  ;;  %v106_v3 = vld [vmem:[#allocation5 + $0xf0] sm:$0xff]  ;;  %v89_v4 = vld [vmem:[#allocation5 + $0x68] sm:$0xff]  ;;  %108 = vmatpush.msra.mxu0 %v91_v0  ;;  %s258_s1 = sshll.u32 %s397_s0, 4  ;;  %s259_s1 = int_to_ptr.vmem [resolvable:$true] %s258_s1 }
   0xe   :  { %290 = vmatpush.msra.mxu3 %v107_v1  ;;  %v105_v5 = vld [vmem:[#allocation5 + $0xe8] sm:$0xff]  ;;  %173 = vmatpush.msra.mxu1 %v107_v1  ;;  %v88_v6 = vld [vmem:[#allocation5 + $0x60] sm:$0xff]  ;;  %v87_v8 = vld [vmem:[#allocation5 + $0x58] sm:$0xff] }
   0xf   :  { %275 = vmatpush.msra.mxu2 %v90_v2  ;;  %v104_v7 = vld [vmem:[#allocation5 + $0xe0] sm:$0xff]  ;;  %109 = vmatpush.msra.mxu0 %v90_v2  ;;  %v103_v9 = vld [vmem:[#allocation5 + $0xd8] sm:$0xff]  ;;  %v86_v10 = vld [vmem:[#allocation5 + $0x50] sm:$0xff] }
  0x10   :  { %291 = vmatpush.msra.mxu3 %v106_v3  ;;  %174 = vmatpush.msra.mxu1 %v106_v3  ;;  %v102_v11 = vld [vmem:[#allocation5 + $0xd0] sm:$0xff]  ;;  %v85_v12 = vld [vmem:[#allocation5 + $0x48] sm:$0xff]  ;;  %v84_v14 = vld [vmem:[#allocation5 + $0x40] sm:$0xff] }
  0x11   :  { %276 = vmatpush.msra.mxu2 %v89_v4  ;;  %110 = vmatpush.msra.mxu0 %v89_v4  ;;  %v101_v13 = vld [vmem:[#allocation5 + $0xc8] sm:$0xff]  ;;  %v100_v15 = vld [vmem:[#allocation5 + $0xc0] sm:$0xff]  ;;  %v83_v16 = vld [vmem:[#allocation5 + $0x38] sm:$0xff] }
  0x12   :  { %292 = vmatpush.msra.mxu3 %v105_v5  ;;  %175 = vmatpush.msra.mxu1 %v105_v5  ;;  %v99_v17 = vld [vmem:[#allocation5 + $0xb8] sm:$0xff]  ;;  %v82_v18 = vld [vmem:[#allocation5 + $0x30] sm:$0xff]  ;;  %v81_v20 = vld [vmem:[#allocation5 + $0x28] sm:$0xff] }
  0x13   :  { %277 = vmatpush.msra.mxu2 %v88_v6  ;;  %111 = vmatpush.msra.mxu0 %v88_v6  ;;  %v98_v19 = vld [vmem:[#allocation5 + $0xb0] sm:$0xff]  ;;  %v97_v21 = vld [vmem:[#allocation5 + $0xa8] sm:$0xff]  ;;  %v80_v22 = vld [vmem:[#allocation5 + $0x20] sm:$0xff] }
  0x14   :  { %293 = vmatpush.msra.mxu3 %v104_v7  ;;  %176 = vmatpush.msra.mxu1 %v104_v7  ;;  %v96_v23 = vld [vmem:[#allocation5 + $0xa0] sm:$0xff]  ;;  %v79_v24 = vld [vmem:[#allocation5 + $0x18] sm:$0xff]  ;;  %v78_v26 = vld [vmem:[#allocation5 + $0x10] sm:$0xff] }
  0x15   :  { %278 = vmatpush.msra.mxu2 %v87_v8  ;;  %112 = vmatpush.msra.mxu0 %v87_v8  ;;  %v95_v25 = vld [vmem:[#allocation5 + $0x98] sm:$0xff]  ;;  %v94_v27 = vld [vmem:[#allocation5 + $0x90] sm:$0xff]  ;;  %v77_v28 = vld [vmem:[#allocation5 + $0x8] sm:$0xff] }
  0x16   :  { %294 = vmatpush.msra.mxu3 %v103_v9  ;;  %177 = vmatpush.msra.mxu1 %v103_v9  ;;  %v93_v29 = vld [vmem:[#allocation5 + $0x88] sm:$0xff]  ;;  %v76_v30 = vld [vmem:[#allocation5] sm:$0xff]  ;;  %v62_v36 = vld [vmem:[#allocation2 + $0x90] sm:$0xff] }
  0x17   :  { %279 = vmatpush.msra.mxu2 %v86_v10  ;;  %113 = vmatpush.msra.mxu0 %v86_v10  ;;  %v92_v31 = vld [vmem:[#allocation5 + $0x80] sm:$0xff]  ;;  %v61_v33 = vld [vmem:[#allocation2 + $0x88] sm:$0xff]  ;;  %v63_v37 = vld [vmem:[#allocation2 + $0x98] sm:$0xff] }
  0x18   :  { %295 = vmatpush.msra.mxu3 %v102_v11  ;;  %178 = vmatpush.msra.mxu1 %v102_v11  ;;  %v60_v32 = vld [vmem:[#allocation2 + $0x80] sm:$0xff]  ;;  %v45_v35 = vld [vmem:[#allocation2 + $0x8] sm:$0xff]  ;;  %v46_v38 = vld [vmem:[#allocation2 + $0x10] sm:$0xff] }
  0x19   :  { %280 = vmatpush.msra.mxu2 %v85_v12  ;;  %114 = vmatpush.msra.mxu0 %v85_v12  ;;  %v44_v34 = vld [vmem:[#allocation2] sm:$0xff]  ;;  %v47_v39 = vld [vmem:[#allocation2 + $0x18] sm:$0xff]  ;;  %v65_v41 = vld [vmem:[#allocation2 + $0xa8] sm:$0xff] }
  0x1a   :  { %296 = vmatpush.msra.mxu3 %v101_v13  ;;  %179 = vmatpush.msra.mxu1 %v101_v13  ;;  %v64_v40 = vld [vmem:[#allocation2 + $0xa0] sm:$0xff]  ;;  %v49_v43 = vld [vmem:[#allocation2 + $0x28] sm:$0xff]  ;;  %v66_v44 = vld [vmem:[#allocation2 + $0xb0] sm:$0xff] }
  0x1b   :  { %281 = vmatpush.msra.mxu2 %v84_v14  ;;  %115 = vmatpush.msra.mxu0 %v84_v14  ;;  %v48_v42 = vld [vmem:[#allocation2 + $0x20] sm:$0xff]  ;;  %v67_v45 = vld [vmem:[#allocation2 + $0xb8] sm:$0xff]  ;;  %v50_v46 = vld [vmem:[#allocation2 + $0x30] sm:$0xff] }
  0x1c   :  { %297 = vmatpush.msra.mxu3 %v100_v15  ;;  %180 = vmatpush.msra.mxu1 %v100_v15  ;;  %v51_v47 = vld [vmem:[#allocation2 + $0x38] sm:$0xff]  ;;  %v68_v48 = vld [vmem:[#allocation2 + $0xc0] sm:$0xff]  ;;  %v69_v49 = vld [vmem:[#allocation2 + $0xc8] sm:$0xff] }
  0x1d   :  { %282 = vmatpush.msra.mxu2 %v83_v16  ;;  %116 = vmatpush.msra.mxu0 %v83_v16  ;;  %v52_v50 = vld [vmem:[#allocation2 + $0x40] sm:$0xff]  ;;  %v53_v51 = vld [vmem:[#allocation2 + $0x48] sm:$0xff]  ;;  %v70_v52 = vld [vmem:[#allocation2 + $0xd0] sm:$0xff] }
  0x1e   :  { %298 = vmatpush.msra.mxu3 %v99_v17  ;;  %181 = vmatpush.msra.mxu1 %v99_v17  ;;  %v71_v53 = vld [vmem:[#allocation2 + $0xd8] sm:$0xff]  ;;  %v54_v54 = vld [vmem:[#allocation2 + $0x50] sm:$0xff]  ;;  %v72_v56 = vld [vmem:[#allocation2 + $0xe0] sm:$0xff] }
  0x1f   :  { %283 = vmatpush.msra.mxu2 %v82_v18  ;;  %117 = vmatpush.msra.mxu0 %v82_v18  ;;  %v55_v55 = vld [vmem:[#allocation2 + $0x58] sm:$0xff]  ;;  %v73_v57 = vld [vmem:[#allocation2 + $0xe8] sm:$0xff]  ;;  %v56_v58 = vld [vmem:[#allocation2 + $0x60] sm:$0xff] }
  0x20   :  { %299 = vmatpush.msra.mxu3 %v98_v19  ;;  %182 = vmatpush.msra.mxu1 %v98_v19  ;;  %v57_v59 = vld [vmem:[#allocation2 + $0x68] sm:$0xff]  ;;  %v74_v60 = vld [vmem:[#allocation2 + $0xf0] sm:$0xff]  ;;  %v75_v61 = vld [vmem:[#allocation2 + $0xf8] sm:$0xff] }
  0x21   :  { %284 = vmatpush.msra.mxu2 %v81_v20  ;;  %118 = vmatpush.msra.mxu0 %v81_v20  ;;  %v58_v62 = vld [vmem:[#allocation2 + $0x70] sm:$0xff]  ;;  %v59_v63 = vld [vmem:[#allocation2 + $0x78] sm:$0xff] }
  0x22   :  { %300 = vmatpush.msra.mxu3 %v97_v21  ;;  %183 = vmatpush.msra.mxu1 %v97_v21 }
  0x23   :  { %285 = vmatpush.msra.mxu2 %v80_v22  ;;  %119 = vmatpush.msra.mxu0 %v80_v22 }
  0x24   :  { %301 = vmatpush.msra.mxu3 %v96_v23  ;;  %184 = vmatpush.msra.mxu1 %v96_v23 }
  0x25   :  { %286 = vmatpush.msra.mxu2 %v79_v24  ;;  %120 = vmatpush.msra.mxu0 %v79_v24 }
  0x26   :  { %302 = vmatpush.msra.mxu3 %v95_v25  ;;  %185 = vmatpush.msra.mxu1 %v95_v25 }
  0x27   :  { %287 = vmatpush.msra.mxu2 %v78_v26  ;;  %121 = vmatpush.msra.mxu0 %v78_v26 }
  0x28   :  { %303 = vmatpush.msra.mxu3 %v94_v27  ;;  %186 = vmatpush.msra.mxu1 %v94_v27 }
  0x29   :  { %288 = vmatpush.msra.mxu2 %v77_v28  ;;  %122 = vmatpush.msra.mxu0 %v77_v28 }
  0x2a   :  { %304 = vmatpush.msra.mxu3 %v93_v29  ;;  %187 = vmatpush.msra.mxu1 %v93_v29 }
  0x2b   :  { %289 = vmatpush.msra.mxu2 %v76_v30  ;;  %123 = vmatpush.msra.mxu0 %v76_v30 }
  0x2c   :  { %305 = vmatpush.msra.mxu3 %v92_v31  ;;  %148 = vmatmul.f32.vlgmr.msra.gmra.mxu2 %v60_v32 }
  0x2d   :  { %213 = vmatmul.f32.vlgmr.msra.gmra.mxu3 %v61_v33  ;;  %188 = vmatpush.msra.mxu1 %v92_v31 }
  0x2e   :  { %124 = vmatmul.f32.vlgmr.msra.gmra.mxu0 %v44_v34  ;;  %189 = vmatmul.f32.vlgmr.msra.gmra.mxu1 %v45_v35 }
  0x34   :  { %151 = vmatmul.f32.gmra.mxu2 %v62_v36 }
  0x35   :  { %216 = vmatmul.f32.gmra.mxu3 %v63_v37 }
  0x36   :  { %127 = vmatmul.f32.gmra.mxu0 %v46_v38  ;;  %192 = vmatmul.f32.gmra.mxu1 %v47_v39 }
  0x3c   :  { %154 = vmatmul.f32.gmra.mxu2 %v64_v40 }
  0x3d   :  { %219 = vmatmul.f32.gmra.mxu3 %v65_v41 }
  0x3e   :  { %130 = vmatmul.f32.gmra.mxu0 %v48_v42  ;;  %195 = vmatmul.f32.gmra.mxu1 %v49_v43 }
  0x44   :  { %157 = vmatmul.f32.gmra.mxu2 %v66_v44 }
  0x45   :  { %222 = vmatmul.f32.gmra.mxu3 %v67_v45 }
  0x46   :  { %133 = vmatmul.f32.gmra.mxu0 %v50_v46  ;;  %198 = vmatmul.f32.gmra.mxu1 %v51_v47 }
  0x4c   :  { %160 = vmatmul.f32.gmra.mxu2 %v68_v48 }
  0x4d   :  { %225 = vmatmul.f32.gmra.mxu3 %v69_v49 }
  0x4e   :  { %136 = vmatmul.f32.gmra.mxu0 %v52_v50  ;;  %201 = vmatmul.f32.gmra.mxu1 %v53_v51 }
  0x54   :  { %163 = vmatmul.f32.gmra.mxu2 %v70_v52 }
  0x55   :  { %228 = vmatmul.f32.gmra.mxu3 %v71_v53 }
  0x56   :  { %139 = vmatmul.f32.gmra.mxu0 %v54_v54  ;;  %204 = vmatmul.f32.gmra.mxu1 %v55_v55 }
  0x5c   :  { %166 = vmatmul.f32.gmra.mxu2 %v72_v56 }
  0x5d   :  { %231 = vmatmul.f32.gmra.mxu3 %v73_v57 }
  0x5e   :  { %142 = vmatmul.f32.gmra.mxu0 %v56_v58  ;;  %207 = vmatmul.f32.gmra.mxu1 %v57_v59 }
  0x64   :  { %169 = vmatmul.f32.gmra.mxu2 %v74_v60 }
  0x65   :  { %234 = vmatmul.f32.gmra.mxu3 %v75_v61 }
  0x66   :  { %145 = vmatmul.f32.gmra.mxu0 %v58_v62  ;;  %210 = vmatmul.f32.gmra.mxu1 %v59_v63 }
  0xab   :  { %v125_v0 = vpop.f32.mrf.mxu0  ;;  %v190_v1 = vpop.f32.mrf.mxu1 }
  0xac   :  { %v191_v2 = vadd.f32 %v190_v1, %v125_v0 }
  0xae   :  { %238 = vst [vmem:[#allocation7] sm:$0xff] %v191_v2 }
  0xaf   :  { %v149_v3 = vpop.f32.mrf.mxu2 }
  0xb0   :  { %v214_v4 = vpop.f32.mrf.mxu3 }
  0xb1   :  { %v215_v5 = vadd.f32 %v214_v4, %v149_v3 }
  0xb3   :  { %246 = vst [vmem:[#allocation7 + $0x40] sm:$0xff] %v215_v5  ;;  %v128_v6 = vpop.f32.mrf.mxu0  ;;  %v193_v7 = vpop.f32.mrf.mxu1 }
  0xb4   :  { %v194_v8 = vadd.f32 %v193_v7, %v128_v6 }
  0xb6   :  { %239 = vst [vmem:[#allocation7 + $0x8] sm:$0xff] %v194_v8 }
  0xb7   :  { %v152_v9 = vpop.f32.mrf.mxu2 }
  0xb8   :  { %v217_v10 = vpop.f32.mrf.mxu3 }
  0xb9   :  { %v218_v11 = vadd.f32 %v217_v10, %v152_v9 }
  0xbb   :  { %247 = vst [vmem:[#allocation7 + $0x48] sm:$0xff] %v218_v11  ;;  %v131_v12 = vpop.f32.mrf.mxu0  ;;  %v196_v13 = vpop.f32.mrf.mxu1 }
  0xbc   :  { %v197_v14 = vadd.f32 %v196_v13, %v131_v12 }
  0xbe   :  { %240 = vst [vmem:[#allocation7 + $0x10] sm:$0xff] %v197_v14 }
  0xbf   :  { %v155_v15 = vpop.f32.mrf.mxu2 }
  0xc0   :  { %v220_v16 = vpop.f32.mrf.mxu3 }
  0xc1   :  { %v221_v17 = vadd.f32 %v220_v16, %v155_v15 }
  0xc3   :  { %248 = vst [vmem:[#allocation7 + $0x50] sm:$0xff] %v221_v17  ;;  %v134_v18 = vpop.f32.mrf.mxu0  ;;  %v199_v19 = vpop.f32.mrf.mxu1 }
  0xc4   :  { %v200_v20 = vadd.f32 %v199_v19, %v134_v18 }
  0xc6   :  { %241 = vst [vmem:[#allocation7 + $0x18] sm:$0xff] %v200_v20 }
  0xc7   :  { %v158_v21 = vpop.f32.mrf.mxu2 }
  0xc8   :  { %v223_v22 = vpop.f32.mrf.mxu3 }
  0xc9   :  { %v224_v23 = vadd.f32 %v223_v22, %v158_v21 }
  0xcb   :  { %249 = vst [vmem:[#allocation7 + $0x58] sm:$0xff] %v224_v23  ;;  %v137_v24 = vpop.f32.mrf.mxu0  ;;  %v202_v25 = vpop.f32.mrf.mxu1 }
  0xcc   :  { %v203_v26 = vadd.f32 %v202_v25, %v137_v24 }
  0xce   :  { %242 = vst [vmem:[#allocation7 + $0x20] sm:$0xff] %v203_v26 }
  0xcf   :  { %v161_v27 = vpop.f32.mrf.mxu2 }
  0xd0   :  { %v226_v28 = vpop.f32.mrf.mxu3 }
  0xd1   :  { %v227_v29 = vadd.f32 %v226_v28, %v161_v27 }
  0xd3   :  { %250 = vst [vmem:[#allocation7 + $0x60] sm:$0xff] %v227_v29  ;;  %v140_v30 = vpop.f32.mrf.mxu0  ;;  %v205_v31 = vpop.f32.mrf.mxu1 }
  0xd4   :  { %v206_v32 = vadd.f32 %v205_v31, %v140_v30 }
  0xd6   :  { %243 = vst [vmem:[#allocation7 + $0x28] sm:$0xff] %v206_v32 }
  0xd7   :  { %v164_v33 = vpop.f32.mrf.mxu2 }
  0xd8   :  { %v229_v34 = vpop.f32.mrf.mxu3 }
  0xd9   :  { %v230_v35 = vadd.f32 %v229_v34, %v164_v33 }
  0xdb   :  { %251 = vst [vmem:[#allocation7 + $0x68] sm:$0xff] %v230_v35  ;;  %v143_v36 = vpop.f32.mrf.mxu0  ;;  %v208_v37 = vpop.f32.mrf.mxu1 }
  0xdc   :  { %v209_v38 = vadd.f32 %v208_v37, %v143_v36 }
  0xde   :  { %244 = vst [vmem:[#allocation7 + $0x30] sm:$0xff] %v209_v38 }
  0xdf   :  { %v167_v39 = vpop.f32.mrf.mxu2 }
  0xe0   :  { %v232_v40 = vpop.f32.mrf.mxu3 }
  0xe1   :  { %v233_v41 = vadd.f32 %v232_v40, %v167_v39 }
  0xe3   :  { %252 = vst [vmem:[#allocation7 + $0x70] sm:$0xff] %v233_v41  ;;  %v146_v42 = vpop.f32.mrf.mxu0  ;;  %v211_v43 = vpop.f32.mrf.mxu1 }
  0xe4   :  { %v212_v44 = vadd.f32 %v211_v43, %v146_v42 }
  0xe6   :  { %245 = vst [vmem:[#allocation7 + $0x38] sm:$0xff] %v212_v44 }
  0xe7   :  { %v170_v45 = vpop.f32.mrf.mxu2 }
  0xe8   :  { %v235_v46 = vpop.f32.mrf.mxu3 }
  0xe9   :  { %v236_v47 = vadd.f32 %v235_v46, %v170_v45 }
  0xeb   :  { %253 = vst [vmem:[#allocation7 + $0x78] sm:$0xff] %v236_v47 }
  0xec   :  { %266 = dma.vmem_to_hbm [thread:$0]  %s259_s1, 2048, %s261_s25, [#allocation4], %s395_s21, %s395_s21, %s396_s22  }
  0xed   :  { %389 = dma.done.wait [#allocation4], 2048  }
  0xee   :  { %390 = vsyncadd [#allocation4], 4294965248 }
  0xef   :  { %271 = vsyncpa [#allocation3], 1 }
  0xf0   :  { %272 = vsyncpa [#allocation6], 1 }
  0xf1   :  { %273 = vsyncpa [#allocation4], 1 }

</bundles_post_ra>
